<compile_context>
chip_gen: v7x
topology: tpu7x:2x2x1
jax: 0.10.0
libtpu: 0.0.40
codegen_flags: <defaults>
</compile_context>

<pallas_src>
import jax
import jax.numpy as jnp
import numpy as np
from jax.experimental import pallas as pl
from jax.experimental.pallas import tpu as pltpu

HIDDEN = 128            # hidden width of the Actor MLP (fixed by the module)
LANE = 128              # TPU lane width: layer-2 weights padded to this for the MXU
DEFAULT_TILE_B = 2048   # batch tile for the grid path (fits v5e 16 MiB scoped VMEM)
GRIDLESS_MAX_B = 1024   # below this, run a single gridless all-in-VMEM call


def _round_up(x, m):
    return (x + m - 1) // m * m


# ---------------------------------------------------------------------------
# Kernel body (shared by the gridless and the batch-tiled call paths).
# ---------------------------------------------------------------------------
def actor_kernel(x_ref, w1_ref, b1_ref, w2_ref, b2_ref, out_ref):
    # Layer 1: Linear + ReLU.  bf16 MXU operands, f32 accumulation.
    x = x_ref[...].astype(w1_ref.dtype)
    h = jnp.dot(x, w1_ref[...], preferred_element_type=jnp.float32)
    h = jnp.maximum(h + b1_ref[...], 0.0)                # f32 VPU
    # Layer 2: Linear + tanh.  W2/b2 are zero-padded to LANE columns so the
    # MXU pass is full-width; slice down to the real action columns *before*
    # the store so only (B, action_dim) ever goes back to HBM.
    a = jnp.dot(h.astype(w2_ref.dtype), w2_ref[...],
                preferred_element_type=jnp.float32)
    a = a + b2_ref[...]                                   # f32 VPU
    na = out_ref.shape[-1]                                # static action_dim
    out_ref[...] = jnp.tanh(a[:, :na]).astype(out_ref.dtype)   # EUP tanh


# ---------------------------------------------------------------------------
# Parameter preparation (done once, outside the per-step forward call):
# cast weights to the MXU dtype and pad layer 2 to a lane-dense width.
# ---------------------------------------------------------------------------
def prepare_actor_params(w1, b1, w2, b2, param_dtype=jnp.bfloat16):
    """w1: (state_dim, HIDDEN), b1: (1, HIDDEN) / (HIDDEN,),
       w2: (HIDDEN, action_dim), b2: (1, action_dim) / (action_dim,)."""
    action_dim = w2.shape[1]
    out_pad = _round_up(action_dim, LANE)
    b1p = jnp.reshape(b1, (1, -1)).astype(jnp.float32)
    w2p = jnp.zeros((w2.shape[0], out_pad), jnp.float32).at[:, :action_dim].set(w2)
    b2p = jnp.zeros((1, out_pad), jnp.float32).at[:, :action_dim].set(
        jnp.reshape(b2, (1, -1)))
    return (w1.astype(param_dtype), b1p, w2p.astype(param_dtype), b2p)


# ---------------------------------------------------------------------------
# Forward wrapper: gridless path for small batches, batch-tiled path for
# large batches (weights resident, batch axis "parallel", ragged tail masked).
# ---------------------------------------------------------------------------
def actor_forward(state, w1, b1, w2p, b2p, *, action_dim,
                  tile_b=DEFAULT_TILE_B, gridless_max_b=GRIDLESS_MAX_B):
    B, state_dim = state.shape

    if B <= gridless_max_b:
        # Single invocation, everything resident in VMEM, no grid machinery.
        return pl.pallas_call(
            actor_kernel,
            out_shape=jax.ShapeDtypeStruct((B, action_dim), jnp.float32),
            in_specs=[pl.BlockSpec(memory_space=pltpu.MemorySpace.VMEM)] * 5,
            out_specs=pl.BlockSpec(memory_space=pltpu.MemorySpace.VMEM),
        )(state, w1, b1, w2p, b2p)

    # Batch-tiled path.  Cap the tile at ceil(B/2) (rounded to the sublane
    # multiple of 8) so there are always >= 2 grid steps for v7x's two
    # TensorCores; no jnp.pad -- Pallas masks the trailing partial block.
    tile = min(tile_b, _round_up(pl.cdiv(B, 2), 8))
    grid = pl.cdiv(B, tile)
    return pl.pallas_call(
        actor_kernel,
        out_shape=jax.ShapeDtypeStruct((B, action_dim), jnp.float32),
        grid_spec=pl.GridSpec(
            grid=(grid,),
            in_specs=[
                pl.BlockSpec((tile, state_dim), lambda i: (i, 0)),
                pl.BlockSpec(w1.shape, lambda i: (0, 0)),   # resident across grid
                pl.BlockSpec(b1.shape, lambda i: (0, 0)),
                pl.BlockSpec(w2p.shape, lambda i: (0, 0)),
                pl.BlockSpec(b2p.shape, lambda i: (0, 0)),
            ],
            out_specs=pl.BlockSpec((tile, action_dim), lambda i: (i, 0)),
        ),
        compiler_params=pltpu.CompilerParams(
            dimension_semantics=("parallel",)),
    )(state, w1, b1, w2p, b2p)


# ---------------------------------------------------------------------------
# Init mirroring the PyTorch module's initialize_parameters(), with weights
# already stored transposed as (in_features, out_features).
# ---------------------------------------------------------------------------
def init_actor_params(key, state_dim, action_dim, hidden=HIDDEN):
    k1, k2, k3, k4 = jax.random.split(key, 4)
    # _hidden_init uses weight.size()[0] == out_features (= hidden).
    bound1 = 1.0 / np.sqrt(hidden)
    w1 = jax.random.uniform(k1, (state_dim, hidden), jnp.float32, -bound1, bound1)
    b1 = jax.random.uniform(k2, (1, hidden), jnp.float32, -bound1, bound1)
    w2 = jax.random.uniform(k3, (hidden, action_dim), jnp.float32, -0.003, 0.003)
    b2 = jax.random.uniform(k4, (1, action_dim), jnp.float32, -0.003, 0.003)
    return w1, b1, w2, b2


def actor_reference(state, w1, b1, w2, b2, param_dtype=jnp.bfloat16):
    """Pure-JAX reference mirroring the kernel's dtype choices
    (bf16 MXU operands, f32 accumulation / bias / ReLU / tanh)."""
    h = jnp.dot(state.astype(param_dtype), w1.astype(param_dtype),
                preferred_element_type=jnp.float32)
    h = jnp.maximum(h + b1, 0.0)
    a = jnp.dot(h.astype(param_dtype), w2.astype(param_dtype),
                preferred_element_type=jnp.float32) + b2
    return jnp.tanh(a)


if __name__ == "__main__":
    # Small shapes consistent with the module (Tennis env: state=24, action=2).
    batch, state_dim, action_dim = 8, 24, 2

    key = jax.random.PRNGKey(0)
    k_params, k_state, k_big = jax.random.split(key, 3)

    w1, b1, w2, b2 = init_actor_params(k_params, state_dim, action_dim)
    w1p, b1p, w2p, b2p = prepare_actor_params(w1, b1, w2, b2)

    fwd = jax.jit(actor_forward,
                  static_argnames=("action_dim", "tile_b", "gridless_max_b"))

    # --- small batch: gridless, all-in-VMEM path -----------------------------
    state = jax.random.normal(k_state, (batch, state_dim), jnp.float32)
    out = jax.block_until_ready(
        fwd(state, w1p, b1p, w2p, b2p, action_dim=action_dim))
    assert out.shape == (batch, action_dim)

    ref = actor_reference(state, w1, b1, w2, b2)                # same dtypes as kernel
    np.testing.assert_allclose(np.asarray(out), np.asarray(ref),
                               rtol=1e-5, atol=1e-5)
    ref_f32 = jnp.tanh(jnp.maximum(state @ w1 + b1, 0.0) @ w2 + b2)
    np.testing.assert_allclose(np.asarray(out), np.asarray(ref_f32),
                               rtol=5e-2, atol=1e-3)            # bf16-weight deviation

    # --- replay-buffer-sized batch: batch-tiled path with a ragged tail ------
    big_batch = 1030                                            # not a multiple of tile
    state_big = jax.random.normal(k_big, (big_batch, state_dim), jnp.float32)
    out_big = jax.block_until_ready(
        fwd(state_big, w1p, b1p, w2p, b2p, action_dim=action_dim))
    assert out_big.shape == (big_batch, action_dim)
    ref_big = actor_reference(state_big, w1, b1, w2, b2)
    np.testing.assert_allclose(np.asarray(out_big), np.asarray(ref_big),
                               rtol=1e-5, atol=1e-5)

    print("KERNEL_OK")
</pallas_src>

<mosaic_0001>
module attributes {stable_mosaic.version = 11 : i64} {
  func.func @actor_kernel(%arg0: memref<8x24xf32, #tpu.memory_space<vmem>>, %arg1: memref<24x128xbf16, #tpu.memory_space<vmem>>, %arg2: memref<1x128xf32, #tpu.memory_space<vmem>>, %arg3: memref<128x128xbf16, #tpu.memory_space<vmem>>, %arg4: memref<1x128xf32, #tpu.memory_space<vmem>>, %arg5: memref<8x2xf32, #tpu.memory_space<vmem>>) attributes {dimension_semantics = [], scalar_prefetch = 0 : i64, scratch_operands = 0 : i64, tpu.core_type = #tpu.core_type<tc>} {
    %c0 = arith.constant 0 : index
    %c0_0 = arith.constant 0 : index
    %0 = vector.load %arg0[%c0, %c0_0] : memref<8x24xf32, #tpu.memory_space<vmem>>, vector<8x24xf32>
    %1 = arith.truncf %0 : vector<8x24xf32> to vector<8x24xbf16>
    %c0_1 = arith.constant 0 : index
    %c0_2 = arith.constant 0 : index
    %2 = vector.load %arg1[%c0_1, %c0_2] : memref<24x128xbf16, #tpu.memory_space<vmem>>, vector<24x128xbf16>
    %cst = arith.constant dense<0.000000e+00> : vector<8x128xf32>
    %3 = tpu.matmul %1, %2, %cst {dimension_numbers = #tpu.dot_dimension_numbers<[1], [0], [0], [1], [0, 0, 1, 1], [], []>} : vector<8x24xbf16>, vector<24x128xbf16>, vector<8x128xf32> -> vector<8x128xf32>
    %c0_3 = arith.constant 0 : index
    %c0_4 = arith.constant 0 : index
    %4 = vector.load %arg2[%c0_3, %c0_4] : memref<1x128xf32, #tpu.memory_space<vmem>>, vector<1x128xf32>
    %5 = vector.broadcast %4 : vector<1x128xf32> to vector<8x128xf32>
    %6 = arith.addf %3, %5 : vector<8x128xf32>
    %cst_5 = arith.constant 0.000000e+00 : f32
    %7 = vector.broadcast %cst_5 : f32 to vector<8x128xf32>
    %8 = arith.maximumf %6, %7 : vector<8x128xf32>
    %9 = arith.truncf %8 : vector<8x128xf32> to vector<8x128xbf16>
    %c0_6 = arith.constant 0 : index
    %c0_7 = arith.constant 0 : index
    %10 = vector.load %arg3[%c0_6, %c0_7] : memref<128x128xbf16, #tpu.memory_space<vmem>>, vector<128x128xbf16>
    %cst_8 = arith.constant dense<0.000000e+00> : vector<8x128xf32>
    %11 = tpu.matmul %9, %10, %cst_8 {dimension_numbers = #tpu.dot_dimension_numbers<[1], [0], [0], [1], [0, 0, 1, 1], [], []>} : vector<8x128xbf16>, vector<128x128xbf16>, vector<8x128xf32> -> vector<8x128xf32>
    %c0_9 = arith.constant 0 : index
    %c0_10 = arith.constant 0 : index
    %12 = vector.load %arg4[%c0_9, %c0_10] : memref<1x128xf32, #tpu.memory_space<vmem>>, vector<1x128xf32>
    %13 = vector.broadcast %12 : vector<1x128xf32> to vector<8x128xf32>
    %14 = arith.addf %11, %13 : vector<8x128xf32>
    %15 = vector.extract_strided_slice %14 {offsets = [0, 0], sizes = [8, 2], strides = [1, 1]} : vector<8x128xf32> to vector<8x2xf32>
    %16 = math.tanh %15 : vector<8x2xf32>
    %c0_11 = arith.constant 0 : index
    %c0_12 = arith.constant 0 : index
    %17 = vector.load %arg5[%c0_11, %c0_12] : memref<8x2xf32, #tpu.memory_space<vmem>>, vector<8x2xf32>
    tpu.vector_store %arg5[%c0_11, %c0_12], %16 {strides = array<i32>} : memref<8x2xf32, #tpu.memory_space<vmem>>, vector<8x2xf32>,
    return
  }
}

</mosaic_0001>

<bundles_post_ra>
// kernel: actor_forward.1
= control target key start
LH: loop header
LB: loop body
LE: loop exit
PB: predicated region body
PF: predicated region fallthrough
CT: control target
= control target key end

     0   :  { %10 = vsyncpa [#allocation3], 0  ;;  %s481_s0 = inlined_call_operand.hbm [shape: f32[8,24], index: 0, kind: input, shape index: {}]   ;;  %s482_s1 = inlined_call_operand.hbm [shape: bf16[24,128], index: 1, kind: input, shape index: {}]   ;;  %s483_s2 = inlined_call_operand.vmem [shape: f32[1,128], index: 2, kind: input, shape index: {}]   ;;  %s484_s3 = inlined_call_operand.hbm [shape: bf16[128,128], index: 3, kind: input, shape index: {}]   ;;  %s485_s4 = inlined_call_operand.vmem [shape: f32[1,128], index: 4, kind: input, shape index: {}]   ;;  %s486_s5 = inlined_call_operand.vmem [shape: f32[8,2], index: 5, kind: output, shape index: {}]  }
   0x1   :  { %11 = vsyncpa [#allocation5], 0  ;;  %s393_s18 = smov [#allocation4]   ;;  %s323_s22 = scalar_lea.hbm %s482_s1, 192 }
   0x2   :  { %s27_s19 = sshll.u32 %s393_s18, 4  ;;  %p324_p0 = scmp.ne.s32.totalorder %s482_s1, %s323_s22  ;;  %s28_s19 = int_to_ptr.vmem [resolvable:$true] %s27_s19 }
   0x3   :  { %p327_p1 = scmp.lt.u32.totalorder %s323_s22, %s482_s1 }
   0x5   :  { %p329_p2 = pnand %p327_p1, %p324_p0 }
   0x7   :  { %332 = shalt.err (!%p329_p2)
}
   0x8   :  { %s333_s27 = scalar_lea.vmem %s28_s19, 192  ;;  %p338_p4 = scmp.lt.s32.totalorder %s28_s19, %s28_s19 }
   0x9   :  { %p334_p3 = scmp.ne.s32.totalorder %s28_s19, %s333_s27  ;;  %p339_p5 = scmp.lt.s32.totalorder %s333_s27, %s333_s27 }
   0xb   :  { %p340_p6 = por %p339_p5, %p338_p4 }
   0xd   :  { %p341_p7 = pnand %p340_p6, %p334_p3 }
   0xf   :  { %344 = shalt.err (!%p341_p7)
}
  0x10   :  { %s394_s28 = smov 64   ;;  %s395_s29 = smov 4  }
  0x11   :  { %33 = dma.hbm_to_vmem [thread:$0]  %s482_s1, 192, %s28_s19, [#allocation5], %s394_s28, %s394_s28, %s395_s29  }
  0x12   :  { %s396_s7 = smov [#allocation2]   ;;  %s397_s9 = smov [#allocation6]  }
  0x13   :  { %s18_s8 = sshll.u32 %s396_s7, 4  ;;  %s41_s10 = sshll.u32 %s397_s9, 4  ;;  %s19_s8 = int_to_ptr.vmem [resolvable:$true] %s18_s8  ;;  %s42_s10 = int_to_ptr.vmem [resolvable:$true] %s41_s10 }
  0x14   :  { %s345_s13 = scalar_lea.hbm %s481_s0, 128 }
  0x15   :  { %p346_p8 = scmp.ne.s32.totalorder %s481_s0, %s345_s13  ;;  %p349_p9 = scmp.lt.u32.totalorder %s345_s13, %s481_s0 }
  0x17   :  { %p351_p10 = pnand %p349_p9, %p346_p8 }
  0x19   :  { %354 = shalt.err (!%p351_p10)
}
  0x1a   :  { %s355_s1 = scalar_lea.vmem %s19_s8, 128  ;;  %p360_p12 = scmp.lt.s32.totalorder %s19_s8, %s19_s8 }
  0x1b   :  { %p356_p11 = scmp.ne.s32.totalorder %s19_s8, %s355_s1  ;;  %p361_p13 = scmp.lt.s32.totalorder %s355_s1, %s355_s1 }
  0x1d   :  { %p362_p0 = por %p361_p13, %p360_p12 }
  0x1f   :  { %p363_p1 = pnand %p362_p0, %p356_p11 }
  0x21   :  { %366 = shalt.err (!%p363_p1)
}
  0x22   :  { %21 = dma.hbm_to_vmem [thread:$0]  %s481_s0, 128, %s19_s8, [#allocation3]  }
  0x23   :  { %s367_s22 = scalar_lea.hbm %s484_s3, 1024 }
  0x24   :  { %p368_p2 = scmp.ne.s32.totalorder %s484_s3, %s367_s22  ;;  %p371_p3 = scmp.lt.u32.totalorder %s367_s22, %s484_s3 }
  0x26   :  { %p373_p4 = pnand %p371_p3, %p368_p2 }
  0x28   :  { %376 = shalt.err (!%p373_p4)
}
  0x29   :  { %s377_s27 = scalar_lea.vmem %s42_s10, 1024  ;;  %p382_p6 = scmp.lt.s32.totalorder %s42_s10, %s42_s10 }
  0x2a   :  { %p378_p5 = scmp.ne.s32.totalorder %s42_s10, %s377_s27  ;;  %p383_p7 = scmp.lt.s32.totalorder %s377_s27, %s377_s27 }
  0x2c   :  { %p384_p8 = por %p383_p7, %p382_p6 }
  0x2e   :  { %p385_p9 = pnand %p384_p8, %p378_p5 }
  0x30   :  { %388 = shalt.err (!%p385_p9)
}
  0x31   :  { %47 = dma.hbm_to_vmem [thread:$0]  %s484_s3, 1024, %s42_s10, [#allocation5], %s394_s28, %s394_s28, %s395_s29  }
  0x32   :  { %389 = dma.done.wait [#allocation3], 128  }
  0x33   :  { %390 = vsyncadd [#allocation3], 4294967168 }
  0x34   :  { %391 = dma.done.wait [#allocation5], 1216  }
  0x35   :  { %392 = vsyncadd [#allocation5], 4294966080  ;;  %v398_v0 = vmov 0.0   ;;  %vm399_vm0 = vmmov 0   ;;  %v311_v1 = vld [vmem:[#allocation4] sm:$0xff]   ;;  %vm85_vm1 = vcmask 1043456  }
  0x36   :  { %276 = vmatprep.subr.bf16.mxu0 %v398_v0  ;;  %280 = vmatprep.mubr.msk.bf16.mxu0 %vm399_vm0, %v398_v0  ;;  %v312_v2 = vld [vmem:[#allocation4 + $0x8] ss:$0 sps:$4 sm:$0xff]   ;;  %v60_v3 = vld [vmem:[#allocation2] sm:$0xff]  ;;  %v313_v4 = vld [vmem:[#allocation6] sm:$0xff]   ;;  %vm81_vm2 = vcmask 195584   ;;  %vm243_vm3 = vcmask 15360  }
  0x37   :  { %284 = vmatprep.subr.bf16.mxu1 %v398_v0  ;;  %300 = vmatprep.mubr.msk.bf16.mxu1 %vm399_vm0, %v398_v0  ;;  %v87_v5 = vsel %vm85_vm1, %v312_v2, 0  ;;  %v314_v6 = vld [vmem:[#allocation6 + $0x8] sm:$0xff]   ;;  %v61_v7 = vpack.c.bf16 %v60_v3, %v60_v3  ;;  %v315_v8 = vld [vmem:[#allocation6 + $0x10] sm:$0xff]   ;;  %v316_v9 = vld [vmem:[#allocation6 + $0x18] sm:$0xff]  }
  0x38   :  { %277 = vmatpush3.bf16.msra.mxu0 %v311_v1  ;;  %285 = vmatpush3.bf16.msra.mxu1 %v313_v4  ;;  %v317_v10 = vld [vmem:[#allocation6 + $0x20] sm:$0xff]   ;;  %v318_v11 = vld [vmem:[#allocation6 + $0x28] sm:$0xff]   ;;  %v319_v12 = vld [vmem:[#allocation6 + $0x30] sm:$0xff]  }
  0x39   :  { %278 = vmatprep.subr.bf16.mxu0 %v398_v0  ;;  %286 = vmatprep.subr.bf16.mxu1 %v398_v0  ;;  %v320_v13 = vld [vmem:[#allocation6 + $0x38] sm:$0xff]   ;;  %v251_v14 = vld [vmem:[%s483_s2] ss:$0 sm:$0xff] }
  0x3a   :  { %v255_v22 = vld [vmem:[%s485_s4] ss:$0 sm:$0xff] }
  0x3c   :  { %279 = vmatpush3.bf16.msra.mxu0 %v87_v5  ;;  %287 = vmatpush3.bf16.msra.mxu1 %v314_v6 }
  0x3d   :  { %288 = vmatprep.subr.bf16.mxu1 %v398_v0 }
  0x3f   :  { %281 = vmatmul.mubr.msk.bf16.vlgmr.msra.gmra.mrb[0].mxu0 %vm81_vm2, %v61_v7 }
  0x40   :  { %289 = vmatpush3.bf16.msra.mxu1 %v315_v8 }
  0x41   :  { %290 = vmatprep.subr.bf16.mxu1 %v398_v0 }
  0x44   :  { %291 = vmatpush3.bf16.msra.mxu1 %v316_v9 }
  0x45   :  { %292 = vmatprep.subr.bf16.mxu1 %v398_v0 }
  0x48   :  { %293 = vmatpush3.bf16.msra.mxu1 %v317_v10 }
  0x49   :  { %294 = vmatprep.subr.bf16.mxu1 %v398_v0 }
  0x4c   :  { %295 = vmatpush3.bf16.msra.mxu1 %v318_v11 }
  0x4d   :  { %296 = vmatprep.subr.bf16.mxu1 %v398_v0 }
  0x50   :  { %297 = vmatpush3.bf16.msra.mxu1 %v319_v12 }
  0x51   :  { %298 = vmatprep.subr.bf16.mxu1 %v398_v0 }
  0x54   :  { %299 = vmatpush3.bf16.msra.mxu1 %v320_v13 }
 0x112   :  { %v123_v15 = vpop.f32.mrb[0].mxu0 }
 0x113   :  { %v124_v16 = vadd.f32 %v251_v14, %v123_v15  ;;  %v282_v17 = vpop.f32.mrb[1].mxu0 }
 0x114   :  { %v126_v18 = vpop.f32.mrb[2].mxu0 }
 0x115   :  { %v129_v19 = vmax.f32 %v124_v16, 0.0  ;;  %v283_v20 = vpop.f32.mrb[3].mxu0 }
 0x117   :  { %v130_v21 = vpack.c.bf16 %v129_v19, %v129_v19 }
 0x119   :  { %301 = vmatmul.mubr.bf16.vlgmr.msra.gmra.mrb[0].mxu1 %v130_v21 }
 0x1ec   :  { %v236_v23 = vpop.f32.mrb[0].mxu1 }
 0x1ed   :  { %v237_v24 = vadd.f32 %v255_v22, %v236_v23  ;;  %v302_v25 = vpop.f32.mrb[1].mxu1 }
 0x1ee   :  { %v239_v26 = vpop.f32.mrb[2].mxu1 }
 0x1ef   :  { %321 = vtanh.f32 %v237_v24  ;;  %v303_v27 = vpop.f32.mrb[3].mxu1 }
 0x1f9   :  { %v322_v28 = vpop.eup %321 }
 0x1fa   :  { %244 = vst.msk [vmem:[%s486_s5] sm:$0xff] %vm243_vm3, %v322_v28 }
 0x1fb   :  { %249 = vsyncpa [#allocation3], 1 }
 0x1fc   :  { %250 = vsyncpa [#allocation5], 1 }

</bundles_post_ra>
